<compile_context>
chip_gen: v7x
topology: tpu7x:2x2x1
jax: 0.10.0
libtpu: 0.0.40
codegen_flags: <defaults>
</compile_context>

<pallas_src>
import functools
import math

import jax
import jax.numpy as jnp
from jax.experimental import pallas as pl
from jax.experimental.pallas import tpu as pltpu

N_GRAPHEME = 168
N_VOWEL = 11
N_CONSONANT = 7
N_CLASSES = N_GRAPHEME + N_VOWEL + N_CONSONANT  # 186
C_PAD = 256                                     # lane-dense / full MXU tile
BIG_NEG = -1e30                                 # "minus inf" for pad classes


def _round_up(x, m):
    return ((x + m - 1) // m) * m


def _classifier_kernel(x_ref, w_ref, b_ref, y_ref, preds_ref, stats_ref,
                       acc_ref, *, tk, nk, w_resident):
    # Only the reduction ("arbitrary") grid axis index is used in-kernel.
    k = pl.program_id(1)

    # ---- K-reduction of the linear head on the MXU (bf16 in, f32 acc) ----
    @pl.when(k == 0)
    def _init():
        acc_ref[...] = jnp.zeros_like(acc_ref)

    if w_resident and nk > 1:
        # W lives fully in VMEM (constant block index); slice the K tile.
        w_blk = w_ref[pl.ds(pl.multiple_of(k * tk, 128), tk), :]
    else:
        # Streamed (TK, C_PAD) block, or resident single block when nk == 1.
        w_blk = w_ref[...]

    acc_ref[...] += jnp.dot(x_ref[...], w_blk,
                            preferred_element_type=jnp.float32)

    @pl.when(k == nk - 1)
    def _finalize():
        logits = acc_ref[...] + b_ref[...]            # (TB, 256) f32
        preds_ref[...] = logits.astype(preds_ref.dtype)

        TB, C = logits.shape
        y = y_ref[...]                                # (TB, 1) int32, -1 = pad
        cls_idx = jax.lax.broadcasted_iota(jnp.int32, (TB, C), 1)

        # ---- cross entropy (numerically stable log-sum-exp) ----
        # NOTE: labels assumed in [0, 186); out-of-range labels would silently
        # hit a BIG_NEG padded column (matches the PyTorch contract).
        row_max = jnp.max(logits, axis=-1, keepdims=True)            # (TB, 1)
        z = logits - row_max
        lse = jnp.log(jnp.sum(jnp.exp(z), axis=-1, keepdims=True))   # (TB, 1)
        true_z = jnp.sum(jnp.where(cls_idx == y, z, 0.0),
                         axis=-1, keepdims=True)                     # (TB, 1)
        per_ex_loss = lse - true_z                                   # (TB, 1)

        # ---- accuracy: first index attaining the row max (argmax) ----
        is_max = logits == row_max
        pred_label = jnp.min(
            jnp.where(is_max, cls_idx, jnp.int32(C)), axis=-1, keepdims=True)
        correct = (pred_label == y).astype(jnp.float32)              # (TB, 1)

        # ---- mask out batch-padding rows (labels padded with -1) ----
        valid = (y >= 0).astype(jnp.float32)                         # (TB, 1)

        loss_sum = jnp.sum(per_ex_loss * valid)
        corr_sum = jnp.sum(correct * valid)

        # per-batch-tile partial sums into a lane-dense (8,128) stats block:
        # row 0 col 0 -> sum of per-example CE, row 1 col 0 -> #correct.
        r = jax.lax.broadcasted_iota(jnp.int32, (8, 128), 0)
        c = jax.lax.broadcasted_iota(jnp.int32, (8, 128), 1)
        stats_ref[...] = jnp.where(
            (r == 0) & (c == 0), loss_sum,
            jnp.where((r == 1) & (c == 0), corr_sum, 0.0))


def bengali_classifier_forward(x_nchw, y, w, b, *, tb=512, tk=4096,
                               w_resident_bytes=16 * 1024 * 1024,
                               preds_dtype=jnp.float32,
                               vmem_limit_bytes=52 * 1024 * 1024):
    """Returns (loss, metrics, preds) matching BengaliClassifier1295.forward.

    tb/tk: batch / feature tile sizes (big tiles -> fewer grid steps, less W
           re-streaming).  On v7x pick tb so the batch has >= 2 tiles to feed
           both TensorCores; on v5e/v6e `vmem_limit_bytes` and
           `w_resident_bytes` can be raised (128 MiB physical VMEM).
    """
    B = x_nchw.shape[0]
    F = math.prod(x_nchw.shape[1:])
    assert w.shape == (F, N_CLASSES)
    assert b.shape == (N_CLASSES,)

    # Tile sizes: bf16-friendly sublane multiple of 16; lane multiple of 128.
    TB = min(_round_up(tb, 16), _round_up(B, 16))
    B_pad = _round_up(B, TB)
    nb = B_pad // TB

    tk = _round_up(tk, 128)
    TK = min(tk, _round_up(F, 128))
    F_pad = _round_up(F, TK)
    nk = F_pad // TK

    # Hold W fully VMEM-resident (fetched exactly once) when it fits.
    w_resident = (F_pad * C_PAD * 2) <= w_resident_bytes

    # bf16 streamed operands; zero padding contributes 0 to the accumulation.
    x_flat = x_nchw.reshape(B, F)
    if x_flat.dtype != jnp.bfloat16:
        # TODO(synk): feed bf16 activations from upstream to skip this extra
        # HBM pass over the dominant stream.
        x_flat = x_flat.astype(jnp.bfloat16)
    if (B_pad, F_pad) != (B, F):
        x_flat = jnp.pad(x_flat, ((0, B_pad - B), (0, F_pad - F)))

    w_p = w.astype(jnp.bfloat16)
    if (F_pad, C_PAD) != (F, N_CLASSES):
        w_p = jnp.pad(w_p, ((0, F_pad - F), (0, C_PAD - N_CLASSES)))

    # Pad classes get a huge-negative bias -> never the max, exp() -> 0.
    b_p = jnp.pad(b.astype(jnp.float32).reshape(1, N_CLASSES),
                  ((0, 0), (0, C_PAD - N_CLASSES)), constant_values=BIG_NEG)

    # Labels: pad rows marked -1 so the kernel can mask them without needing
    # the batch-axis program_id.
    y_p = y.astype(jnp.int32).reshape(B, 1)
    if B_pad != B:
        y_p = jnp.pad(y_p, ((0, B_pad - B), (0, 0)), constant_values=-1)

    if w_resident:
        # Constant block index -> W DMA'd once and kept resident in VMEM.
        w_spec = pl.BlockSpec((F_pad, C_PAD), lambda i, k: (0, 0))
    else:
        w_spec = pl.BlockSpec((TK, C_PAD), lambda i, k: (k, 0))

    kernel = functools.partial(_classifier_kernel, tk=TK, nk=nk,
                               w_resident=w_resident)

    preds_pad, stats = pl.pallas_call(
        kernel,
        out_shape=(
            jax.ShapeDtypeStruct((B_pad, C_PAD), preds_dtype),
            jax.ShapeDtypeStruct((8, 128 * nb), jnp.float32),
        ),
        grid_spec=pltpu.PrefetchScalarGridSpec(
            num_scalar_prefetch=0,
            grid=(nb, nk),
            in_specs=[
                pl.BlockSpec((TB, TK), lambda i, k: (i, k)),       # x
                w_spec,                                            # w
                pl.BlockSpec((1, C_PAD), lambda i, k: (0, 0)),     # bias
                pl.BlockSpec((TB, 1), lambda i, k: (i, 0)),        # labels
            ],
            out_specs=(
                pl.BlockSpec((TB, C_PAD), lambda i, k: (i, 0)),    # preds
                pl.BlockSpec((8, 128), lambda i, k: (0, i)),       # stats
            ),
            scratch_shapes=[pltpu.VMEM((TB, C_PAD), jnp.float32)],
        ),
        compiler_params=pltpu.CompilerParams(
            dimension_semantics=("parallel", "arbitrary"),
            vmem_limit_bytes=vmem_limit_bytes,
        ),
    )(x_flat, w_p, b_p, y_p)

    # Tiny final reductions over per-tile partials (rows 0/1 of the stats slab
    # are zero except at the per-tile marker columns, so whole-row sums work).
    loss = jnp.sum(stats[0]) / jnp.float32(B)
    acc = jnp.sum(stats[1]) / jnp.float32(B)
    preds = preds_pad[:B, :N_CLASSES]
    metrics = {"loss": loss, "acc": acc}
    return loss, metrics, preds


if __name__ == "__main__":
    # Small shapes consistent with the module's usage (NCHW image classifier).
    B, C, H, W = 2, 4, 16, 16
    F_in = C * H * W

    key = jax.random.PRNGKey(0)
    kx, kw, kb, ky = jax.random.split(key, 4)

    x = jax.random.normal(kx, (B, C, H, W), dtype=jnp.float32)
    w = jax.random.normal(kw, (F_in, N_CLASSES), dtype=jnp.float32) * 0.02
    bias = jax.random.normal(kb, (N_CLASSES,), dtype=jnp.float32) * 0.01
    y = jax.random.randint(ky, (B,), 0, N_CLASSES, dtype=jnp.int32)

    loss, metrics, preds = bengali_classifier_forward(x, y, w, bias)
    jax.block_until_ready((loss, metrics["acc"], preds))

    # Plain-JAX reference with the same bf16 operand rounding.
    xf = x.reshape(B, -1).astype(jnp.bfloat16).astype(jnp.float32)
    wf = w.astype(jnp.bfloat16).astype(jnp.float32)
    logits_ref = xf @ wf + bias
    m = jnp.max(logits_ref, axis=1, keepdims=True)
    lse = jnp.log(jnp.sum(jnp.exp(logits_ref - m), axis=1, keepdims=True)) + m
    loss_ref = jnp.mean(lse[:, 0] - logits_ref[jnp.arange(B), y])

    assert preds.shape == (B, N_CLASSES)
    assert bool(jnp.isfinite(loss))
    assert bool(jnp.allclose(preds, logits_ref, rtol=2e-2, atol=2e-2))
    assert bool(jnp.allclose(loss, loss_ref, rtol=2e-2, atol=2e-2))
    assert 0.0 <= float(metrics["acc"]) <= 1.0
    print("KERNEL_OK")
</pallas_src>

<mosaic_0001>
module attributes {stable_mosaic.version = 11 : i64} {
  func.func @_classifier_kernel(%arg0: i32, %arg1: i32, %arg2: memref<16x1024xbf16, #tpu.memory_space<vmem>>, %arg3: memref<1024x256xbf16, #tpu.memory_space<vmem>>, %arg4: memref<1x256xf32, #tpu.memory_space<vmem>>, %arg5: memref<16x1xi32, #tpu.memory_space<vmem>>, %arg6: memref<16x256xf32, #tpu.memory_space<vmem>>, %arg7: memref<8x128xf32, #tpu.memory_space<vmem>>, %arg8: memref<16x256xf32, #tpu.memory_space<vmem>>) attributes {dimension_semantics = [#tpu.dimension_semantics<parallel>, #tpu.dimension_semantics<arbitrary>], iteration_bounds = array<i64: 1, 1>, scalar_prefetch = 0 : i64, scratch_operands = 1 : i64, tpu.core_type = #tpu.core_type<tc>, window_params = [{transform_indices = @transform_0, window_bounds = array<i64: 16, 1024>}, {pipeline_mode = #tpu.pipeline_mode<synchronous>, transform_indices = @transform_1, window_bounds = array<i64: 1024, 256>}, {pipeline_mode = #tpu.pipeline_mode<synchronous>, transform_indices = @transform_2, window_bounds = array<i64: 1, 256>}, {transform_indices = @transform_3, window_bounds = array<i64: 16, 1>}, {transform_indices = @transform_4, window_bounds = array<i64: 16, 256>}, {transform_indices = @transform_5, window_bounds = array<i64: 8, 128>}]} {
    %c0_i32 = arith.constant 0 : i32
    %0 = arith.cmpi eq, %arg1, %c0_i32 : i32
    %1 = arith.extui %0 : i1 to i32
    %c0_i32_0 = arith.constant 0 : i32
    %2 = arith.cmpi ne, %1, %c0_i32_0 : i32
    scf.if %2 {
      %cst_10 = arith.constant 0.000000e+00 : f32
      %12 = vector.broadcast %cst_10 : f32 to vector<16x256xf32>
      %c0_11 = arith.constant 0 : index
      %c0_12 = arith.constant 0 : index
      %13 = vector.load %arg8[%c0_11, %c0_12] : memref<16x256xf32, #tpu.memory_space<vmem>>, vector<16x256xf32>
      tpu.vector_store %arg8[%c0_11, %c0_12], %12 {strides = array<i32>} : memref<16x256xf32, #tpu.memory_space<vmem>>, vector<16x256xf32>,
    } else {
    }
    %c0 = arith.constant 0 : index
    %c0_1 = arith.constant 0 : index
    %3 = vector.load %arg3[%c0, %c0_1] : memref<1024x256xbf16, #tpu.memory_space<vmem>>, vector<1024x256xbf16>
    %c0_2 = arith.constant 0 : index
    %c0_3 = arith.constant 0 : index
    %4 = vector.load %arg8[%c0_2, %c0_3] : memref<16x256xf32, #tpu.memory_space<vmem>>, vector<16x256xf32>
    %c0_4 = arith.constant 0 : index
    %c0_5 = arith.constant 0 : index
    %5 = vector.load %arg2[%c0_4, %c0_5] : memref<16x1024xbf16, #tpu.memory_space<vmem>>, vector<16x1024xbf16>
    %cst = arith.constant dense<0.000000e+00> : vector<16x256xf32>
    %6 = tpu.matmul %5, %3, %cst {dimension_numbers = #tpu.dot_dimension_numbers<[1], [0], [0], [1], [0, 0, 1, 1], [], []>} : vector<16x1024xbf16>, vector<1024x256xbf16>, vector<16x256xf32> -> vector<16x256xf32>
    %7 = arith.addf %4, %6 : vector<16x256xf32>
    %c0_6 = arith.constant 0 : index
    %c0_7 = arith.constant 0 : index
    %8 = vector.load %arg8[%c0_6, %c0_7] : memref<16x256xf32, #tpu.memory_space<vmem>>, vector<16x256xf32>
    tpu.vector_store %arg8[%c0_6, %c0_7], %7 {strides = array<i32>} : memref<16x256xf32, #tpu.memory_space<vmem>>, vector<16x256xf32>,
    %c0_i32_8 = arith.constant 0 : i32
    %9 = arith.cmpi eq, %arg1, %c0_i32_8 : i32
    %10 = arith.extui %9 : i1 to i32
    %c0_i32_9 = arith.constant 0 : i32
    %11 = arith.cmpi ne, %10, %c0_i32_9 : i32
    scf.if %11 {
      %c0_10 = arith.constant 0 : index
      %c0_11 = arith.constant 0 : index
      %12 = vector.load %arg8[%c0_10, %c0_11] : memref<16x256xf32, #tpu.memory_space<vmem>>, vector<16x256xf32>
      %c0_12 = arith.constant 0 : index
      %c0_13 = arith.constant 0 : index
      %13 = vector.load %arg4[%c0_12, %c0_13] : memref<1x256xf32, #tpu.memory_space<vmem>>, vector<1x256xf32>
      %14 = vector.broadcast %13 : vector<1x256xf32> to vector<16x256xf32>
      %15 = arith.addf %12, %14 : vector<16x256xf32>
      %c0_14 = arith.constant 0 : index
      %c0_15 = arith.constant 0 : index
      %16 = vector.load %arg6[%c0_14, %c0_15] : memref<16x256xf32, #tpu.memory_space<vmem>>, vector<16x256xf32>
      tpu.vector_store %arg6[%c0_14, %c0_15], %15 {strides = array<i32>} : memref<16x256xf32, #tpu.memory_space<vmem>>, vector<16x256xf32>,
      %c0_16 = arith.constant 0 : index
      %c0_17 = arith.constant 0 : index
      %17 = vector.load %arg5[%c0_16, %c0_17] : memref<16x1xi32, #tpu.memory_space<vmem>>, vector<16x1xi32>
      %18 = tpu.iota {dimensions = array<i32: 1>} : vector<16x256xi32>
      %cst_18 = arith.constant dense<0xFF800000> : vector<16xf32>
      %19 = vector.multi_reduction <maximumf>, %15, %cst_18 [1] : vector<16x256xf32> to vector<16xf32>
      %20 = vector.shape_cast %19 : vector<16xf32> to vector<16x1xf32>
      %21 = vector.broadcast %20 : vector<16x1xf32> to vector<16x256xf32>
      %22 = arith.subf %15, %21 : vector<16x256xf32>
      %23 = math.exp %22 : vector<16x256xf32>
      %cst_19 = arith.constant dense<0.000000e+00> : vector<16xf32>
      %24 = vector.multi_reduction <add>, %23, %cst_19 [1] : vector<16x256xf32> to vector<16xf32>
      %25 = vector.shape_cast %24 : vector<16xf32> to vector<16x1xf32>
      %26 = math.log %25 : vector<16x1xf32>
      %27 = vector.broadcast %17 : vector<16x1xi32> to vector<16x256xi32>
      %28 = arith.cmpi eq, %18, %27 : vector<16x256xi32>
      %cst_20 = arith.constant 0.000000e+00 : f32
      %29 = vector.broadcast %cst_20 : f32 to vector<16x256xf32>
      %30 = arith.select %28, %22, %29 : vector<16x256xi1>, vector<16x256xf32>
      %cst_21 = arith.constant dense<0.000000e+00> : vector<16xf32>
      %31 = vector.multi_reduction <add>, %30, %cst_21 [1] : vector<16x256xf32> to vector<16xf32>
      %32 = vector.shape_cast %31 : vector<16xf32> to vector<16x1xf32>
      %33 = arith.subf %26, %32 : vector<16x1xf32>
      %34 = vector.broadcast %20 : vector<16x1xf32> to vector<16x256xf32>
      %35 = arith.cmpf oeq, %15, %34 : vector<16x256xf32>
      %c256_i32 = arith.constant 256 : i32
      %36 = vector.broadcast %c256_i32 : i32 to vector<16x256xi32>
      %37 = arith.select %35, %18, %36 : vector<16x256xi1>, vector<16x256xi32>
      %cst_22 = arith.constant dense<2147483647> : vector<16xi32>
      %38 = vector.multi_reduction <minsi>, %37, %cst_22 [1] : vector<16x256xi32> to vector<16xi32>
      %39 = vector.shape_cast %38 : vector<16xi32> to vector<16x1xi32>
      %40 = arith.cmpi eq, %39, %17 : vector<16x1xi32>
      %41 = arith.extui %40 : vector<16x1xi1> to vector<16x1xi32>
      %42 = arith.sitofp %41 : vector<16x1xi32> to vector<16x1xf32>
      %c0_i32_23 = arith.constant 0 : i32
      %43 = vector.broadcast %c0_i32_23 : i32 to vector<16x1xi32>
      %44 = arith.cmpi sge, %17, %43 : vector<16x1xi32>
      %45 = arith.extui %44 : vector<16x1xi1> to vector<16x1xi32>
      %46 = arith.sitofp %45 : vector<16x1xi32> to vector<16x1xf32>
      %47 = arith.mulf %33, %46 : vector<16x1xf32>
      %48 = vector.shape_cast %47 : vector<16x1xf32> to vector<1x16x1xf32>
      %cst_24 = arith.constant dense<0.000000e+00> : vector<1xf32>
      %49 = vector.multi_reduction <add>, %48, %cst_24 [1, 2] : vector<1x16x1xf32> to vector<1xf32>
      %50 = vector.shape_cast %49 : vector<1xf32> to vector<1x1x1xf32>
      %51 = vector.extract %50[0, 0, 0] : f32 from vector<1x1x1xf32>
      %52 = arith.mulf %42, %46 : vector<16x1xf32>
      %53 = vector.shape_cast %52 : vector<16x1xf32> to vector<1x16x1xf32>
      %cst_25 = arith.constant dense<0.000000e+00> : vector<1xf32>
      %54 = vector.multi_reduction <add>, %53, %cst_25 [1, 2] : vector<1x16x1xf32> to vector<1xf32>
      %55 = vector.shape_cast %54 : vector<1xf32> to vector<1x1x1xf32>
      %56 = vector.extract %55[0, 0, 0] : f32 from vector<1x1x1xf32>
      %57 = tpu.iota {dimensions = array<i32: 0>} : vector<8x128xi32>
      %58 = tpu.iota {dimensions = array<i32: 1>} : vector<8x128xi32>
      %c0_i32_26 = arith.constant 0 : i32
      %59 = vector.broadcast %c0_i32_26 : i32 to vector<8x128xi32>
      %60 = arith.cmpi eq, %57, %59 : vector<8x128xi32>
      %c0_i32_27 = arith.constant 0 : i32
      %61 = vector.broadcast %c0_i32_27 : i32 to vector<8x128xi32>
      %62 = arith.cmpi eq, %58, %61 : vector<8x128xi32>
      %63 = arith.andi %60, %62 : vector<8x128xi1>
      %c1_i32 = arith.constant 1 : i32
      %64 = vector.broadcast %c1_i32 : i32 to vector<8x128xi32>
      %65 = arith.cmpi eq, %57, %64 : vector<8x128xi32>
      %c0_i32_28 = arith.constant 0 : i32
      %66 = vector.broadcast %c0_i32_28 : i32 to vector<8x128xi32>
      %67 = arith.cmpi eq, %58, %66 : vector<8x128xi32>
      %68 = arith.andi %65, %67 : vector<8x128xi1>
      %cst_29 = arith.constant 0.000000e+00 : f32
      %69 = vector.broadcast %56 : f32 to vector<8x128xf32>
      %70 = vector.broadcast %cst_29 : f32 to vector<8x128xf32>
      %71 = arith.select %68, %69, %70 : vector<8x128xi1>, vector<8x128xf32>
      %72 = vector.broadcast %51 : f32 to vector<8x128xf32>
      %73 = arith.select %63, %72, %71 : vector<8x128xi1>, vector<8x128xf32>
      %c0_30 = arith.constant 0 : index
      %c0_31 = arith.constant 0 : index
      %74 = vector.load %arg7[%c0_30, %c0_31] : memref<8x128xf32, #tpu.memory_space<vmem>>, vector<8x128xf32>
      tpu.vector_store %arg7[%c0_30, %c0_31], %73 {strides = array<i32>} : memref<8x128xf32, #tpu.memory_space<vmem>>, vector<8x128xf32>,
    } else {
    }
    return
  }
  func.func @transform_0(%arg0: i32, %arg1: i32) -> (i32, i32) {
    %c0_i32 = arith.constant 0 : i32
    return %arg0, %arg1 : i32, i32
  }
  func.func @transform_1(%arg0: i32, %arg1: i32) -> (i32, i32) {
    %c0_i32 = arith.constant 0 : i32
    %c0_i32_0 = arith.constant 0 : i32
    %c0_i32_1 = arith.constant 0 : i32
    return %c0_i32, %c0_i32_0 : i32, i32
  }
  func.func @transform_2(%arg0: i32, %arg1: i32) -> (i32, i32) {
    %c0_i32 = arith.constant 0 : i32
    %c0_i32_0 = arith.constant 0 : i32
    %c0_i32_1 = arith.constant 0 : i32
    return %c0_i32, %c0_i32_0 : i32, i32
  }
  func.func @transform_3(%arg0: i32, %arg1: i32) -> (i32, i32) {
    %c0_i32 = arith.constant 0 : i32
    %c0_i32_0 = arith.constant 0 : i32
    return %arg0, %c0_i32 : i32, i32
  }
  func.func @transform_4(%arg0: i32, %arg1: i32) -> (i32, i32) {
    %c0_i32 = arith.constant 0 : i32
    %c0_i32_0 = arith.constant 0 : i32
    return %arg0, %c0_i32 : i32, i32
  }
  func.func @transform_5(%arg0: i32, %arg1: i32) -> (i32, i32) {
    %c0_i32 = arith.constant 0 : i32
    %c0_i32_0 = arith.constant 0 : i32
    return %c0_i32, %arg0 : i32, i32
  }
}

</mosaic_0001>

<bundles_post_ra>
// kernel: tpu_custom_call.1
= control target key start
LH: loop header
LB: loop body
LE: loop exit
PB: predicated region body
PF: predicated region fallthrough
CT: control target
= control target key end

     0   :  { %11 = vsyncpa [#allocation4], 0  ;;  %s1879_s0 = inlined_call_operand.hbm [shape: bf16[16,1024], index: 0, kind: input, shape index: {}]   ;;  %s1880_s1 = inlined_call_operand.hbm [shape: bf16[1024,256], index: 1, kind: input, shape index: {}]   ;;  %s1881_s2 = inlined_call_operand.vmem [shape: f32[1,256], index: 2, kind: input, shape index: {}]   ;;  %s1882_s3 = inlined_call_operand.vmem [shape: s32[16,1], index: 3, kind: input, shape index: {}]   ;;  %s1883_s4 = inlined_call_operand.hbm [shape: f32[16,256], index: 4, kind: output, shape index: {0}]   ;;  %s1884_s5 = inlined_call_operand.hbm [shape: f32[8,128], index: 5, kind: output, shape index: {1}]  }
   0x1   :  { %12 = vsyncpa [#allocation7], 0 }
   0x2   :  { %13 = vsyncpa [#allocation5], 0 }
   0x3   :  { %14 = vsyncpa [#allocation10], 0  ;;  %s1734_s18 = smov [#allocation3]   ;;  %s1638_s22 = scalar_lea.hbm %s1879_s0, 1024 }
   0x4   :  { %s20_s19 = sshll.u32 %s1734_s18, 4  ;;  %p1639_p0 = scmp.ne.s32.totalorder %s1879_s0, %s1638_s22  ;;  %s21_s19 = int_to_ptr.vmem [resolvable:$true] %s20_s19 }
   0x5   :  { %p1642_p1 = scmp.lt.u32.totalorder %s1638_s22, %s1879_s0 }
   0x7   :  { %p1644_p2 = pnand %p1642_p1, %p1639_p0 }
   0x9   :  { %1647 = shalt.err (!%p1644_p2)
}
   0xa   :  { %s1648_s27 = scalar_lea.vmem %s21_s19, 1024  ;;  %p1653_p4 = scmp.lt.s32.totalorder %s21_s19, %s21_s19 }
   0xb   :  { %p1649_p3 = scmp.ne.s32.totalorder %s21_s19, %s1648_s27  ;;  %p1654_p5 = scmp.lt.s32.totalorder %s1648_s27, %s1648_s27 }
   0xd   :  { %p1655_p6 = por %p1654_p5, %p1653_p4 }
   0xf   :  { %p1656_p7 = pnand %p1655_p6, %p1649_p3 }
  0x11   :  { %1659 = shalt.err (!%p1656_p7)
}
  0x12   :  { %s1735_s28 = smov 512   ;;  %s1736_s29 = smov 32  }
  0x13   :  { %26 = dma.hbm_to_vmem [thread:$0]  %s1879_s0, 1024, %s21_s19, [#allocation4], %s1735_s28, %s1735_s28, %s1736_s29  }
  0x14   :  { %s1737_s7 = smov [#allocation6]   ;;  %s1660_s11 = scalar_lea.hbm %s1880_s1, 16384 }
  0x15   :  { %s32_s8 = sshll.u32 %s1737_s7, 4  ;;  %p1661_p8 = scmp.ne.s32.totalorder %s1880_s1, %s1660_s11  ;;  %s33_s8 = int_to_ptr.vmem [resolvable:$true] %s32_s8 }
  0x16   :  { %p1664_p9 = scmp.lt.u32.totalorder %s1660_s11, %s1880_s1 }
  0x18   :  { %p1666_p10 = pnand %p1664_p9, %p1661_p8 }
  0x1a   :  { %1669 = shalt.err (!%p1666_p10)
}
  0x1b   :  { %s1670_s16 = scalar_lea.vmem %s33_s8, 16384  ;;  %p1675_p12 = scmp.lt.s32.totalorder %s33_s8, %s33_s8 }
  0x1c   :  { %p1671_p11 = scmp.ne.s32.totalorder %s33_s8, %s1670_s16  ;;  %p1676_p13 = scmp.lt.s32.totalorder %s1670_s16, %s1670_s16 }
  0x1e   :  { %p1677_p0 = por %p1676_p13, %p1675_p12 }
  0x20   :  { %p1678_p1 = pnand %p1677_p0, %p1671_p11 }
  0x22   :  { %1681 = shalt.err (!%p1678_p1)
}
  0x23   :  { %s1738_s0 = smov 128   ;;  %s1739_s17 = smov 8  }
  0x24   :  { %38 = dma.hbm_to_vmem [thread:$0]  %s1880_s1, 16384, %s33_s8, [#allocation7], %s1738_s0, %s1738_s0, %s1739_s17  }
  0x25   :  { %1726 = dma.done.wait [#allocation4], 1024  }
  0x26   :  { %1727 = vsyncadd [#allocation4], 4294966272 }
  0x27   :  { %1728 = dma.done.wait [#allocation7], 16384  }
  0x28   :  { %1729 = vsyncadd [#allocation7], 4294950912  ;;  %v1434_v0 = vld [vmem:[#allocation6 + $0x4] ss:$8 sps:$4 sm:$0xff]   ;;  %v1438_v2 = vld [vmem:[#allocation6] ss:$8 sps:$4 sm:$0xff]  }
  0x29   :  { %v1436_v1 = vld [vmem:[#allocation6 + $0x204] ss:$8 sps:$4 sm:$0xff]   ;;  %877 = vmatprep.subr.bf16.mxu1 %v1434_v0  ;;  %v1439_v3 = vld [vmem:[#allocation6 + $0x200] ss:$8 sps:$4 sm:$0xff]   ;;  %v1440_v4 = vld [vmem:[#allocation6 + $0x14] ss:$8 sps:$4 sm:$0xff]  }
  0x2a   :  { %963 = vmatprep.subr.bf16.mxu0 %v1436_v1  ;;  %878 = vmatpush1.bf16.msra.mxu1 %v1438_v2  ;;  %v1442_v5 = vld [vmem:[#allocation6 + $0x214] ss:$8 sps:$4 sm:$0xff]   ;;  %v1444_v6 = vld [vmem:[#allocation6 + $0x10] ss:$8 sps:$4 sm:$0xff]   ;;  %v1446_v8 = vld [vmem:[#allocation6 + $0x24] ss:$8 sps:$4 sm:$0xff]  }
  0x2b   :  { %964 = vmatpush1.bf16.msra.mxu0 %v1439_v3  ;;  %879 = vmatprep.subr.bf16.mxu1 %v1440_v4  ;;  %v1445_v7 = vld [vmem:[#allocation6 + $0x210] ss:$8 sps:$4 sm:$0xff]   ;;  %v1448_v9 = vld [vmem:[#allocation6 + $0x224] ss:$8 sps:$4 sm:$0xff]   ;;  %v1450_v10 = vld [vmem:[#allocation6 + $0x20] ss:$8 sps:$4 sm:$0xff]  }
  0x2c   :  { %965 = vmatprep.subr.bf16.mxu0 %v1442_v5  ;;  %v1451_v11 = vld [vmem:[#allocation6 + $0x220] ss:$8 sps:$4 sm:$0xff]   ;;  %v1452_v12 = vld [vmem:[#allocation6 + $0x34] ss:$8 sps:$4 sm:$0xff]   ;;  %v1456_v14 = vld [vmem:[#allocation6 + $0x30] ss:$8 sps:$4 sm:$0xff]  }
  0x2d   :  { %v1454_v13 = vld [vmem:[#allocation6 + $0x234] ss:$8 sps:$4 sm:$0xff]   ;;  %v1457_v15 = vld [vmem:[#allocation6 + $0x230] ss:$8 sps:$4 sm:$0xff]   ;;  %v1458_v16 = vld [vmem:[#allocation6 + $0x44] ss:$8 sps:$4 sm:$0xff]  }
  0x2e   :  { %880 = vmatpush1.bf16.msra.mxu1 %v1444_v6  ;;  %v1460_v17 = vld [vmem:[#allocation6 + $0x244] ss:$8 sps:$4 sm:$0xff]   ;;  %v1462_v18 = vld [vmem:[#allocation6 + $0x40] ss:$8 sps:$4 sm:$0xff]   ;;  %v1464_v20 = vld [vmem:[#allocation6 + $0x54] ss:$8 sps:$4 sm:$0xff]  }
  0x2f   :  { %966 = vmatpush1.bf16.msra.mxu0 %v1445_v7  ;;  %881 = vmatprep.subr.bf16.mxu1 %v1446_v8  ;;  %v1463_v19 = vld [vmem:[#allocation6 + $0x240] ss:$8 sps:$4 sm:$0xff]   ;;  %v1466_v21 = vld [vmem:[#allocation6 + $0x254] ss:$8 sps:$4 sm:$0xff]   ;;  %v1468_v22 = vld [vmem:[#allocation6 + $0x50] ss:$8 sps:$4 sm:$0xff]  }
  0x30   :  { %967 = vmatprep.subr.bf16.mxu0 %v1448_v9  ;;  %v1469_v23 = vld [vmem:[#allocation6 + $0x250] ss:$8 sps:$4 sm:$0xff]   ;;  %v1470_v24 = vld [vmem:[#allocation6 + $0x64] ss:$8 sps:$4 sm:$0xff]   ;;  %v1474_v26 = vld [vmem:[#allocation6 + $0x60] ss:$8 sps:$4 sm:$0xff]  }
  0x31   :  { %v1472_v25 = vld [vmem:[#allocation6 + $0x264] ss:$8 sps:$4 sm:$0xff]   ;;  %v1475_v27 = vld [vmem:[#allocation6 + $0x260] ss:$8 sps:$4 sm:$0xff]   ;;  %v1476_v28 = vld [vmem:[#allocation6 + $0x74] ss:$8 sps:$4 sm:$0xff]  }
  0x32   :  { %882 = vmatpush1.bf16.msra.mxu1 %v1450_v10  ;;  %v1478_v29 = vld [vmem:[#allocation6 + $0x274] ss:$8 sps:$4 sm:$0xff]   ;;  %v1480_v30 = vld [vmem:[#allocation6 + $0x70] ss:$8 sps:$4 sm:$0xff]   ;;  %v1482_v32 = vld [vmem:[#allocation6 + $0x84] ss:$8 sps:$4 sm:$0xff]  }
  0x33   :  { %968 = vmatpush1.bf16.msra.mxu0 %v1451_v11  ;;  %883 = vmatprep.subr.bf16.mxu1 %v1452_v12  ;;  %v1481_v31 = vld [vmem:[#allocation6 + $0x270] ss:$8 sps:$4 sm:$0xff]   ;;  %v1484_v33 = vld [vmem:[#allocation6 + $0x284] ss:$8 sps:$4 sm:$0xff]   ;;  %v1486_v34 = vld [vmem:[#allocation6 + $0x80] ss:$8 sps:$4 sm:$0xff]  }
  0x34   :  { %969 = vmatprep.subr.bf16.mxu0 %v1454_v13  ;;  %v1487_v35 = vld [vmem:[#allocation6 + $0x280] ss:$8 sps:$4 sm:$0xff]   ;;  %v1488_v36 = vld [vmem:[#allocation6 + $0x94] ss:$8 sps:$4 sm:$0xff]   ;;  %v1492_v38 = vld [vmem:[#allocation6 + $0x90] ss:$8 sps:$4 sm:$0xff]  }
  0x35   :  { %v1490_v37 = vld [vmem:[#allocation6 + $0x294] ss:$8 sps:$4 sm:$0xff]   ;;  %v1493_v39 = vld [vmem:[#allocation6 + $0x290] ss:$8 sps:$4 sm:$0xff]   ;;  %v1494_v40 = vld [vmem:[#allocation6 + $0xa4] ss:$8 sps:$4 sm:$0xff]  }
  0x36   :  { %884 = vmatpush1.bf16.msra.mxu1 %v1456_v14  ;;  %v1496_v41 = vld [vmem:[#allocation6 + $0x2a4] ss:$8 sps:$4 sm:$0xff]   ;;  %v1498_v42 = vld [vmem:[#allocation6 + $0xa0] ss:$8 sps:$4 sm:$0xff]   ;;  %v1500_v44 = vld [vmem:[#allocation6 + $0xb4] ss:$8 sps:$4 sm:$0xff]  }
  0x37   :  { %970 = vmatpush1.bf16.msra.mxu0 %v1457_v15  ;;  %885 = vmatprep.subr.bf16.mxu1 %v1458_v16  ;;  %v1499_v43 = vld [vmem:[#allocation6 + $0x2a0] ss:$8 sps:$4 sm:$0xff]   ;;  %v1502_v45 = vld [vmem:[#allocation6 + $0x2b4] ss:$8 sps:$4 sm:$0xff]   ;;  %v1504_v46 = vld [vmem:[#allocation6 + $0xb0] ss:$8 sps:$4 sm:$0xff]  }
  0x38   :  { %971 = vmatprep.subr.bf16.mxu0 %v1460_v17  ;;  %v1505_v47 = vld [vmem:[#allocation6 + $0x2b0] ss:$8 sps:$4 sm:$0xff]   ;;  %v189_v48 = vld [vmem:[#allocation3] sm:$0xff]  ;;  %v1512_v58 = vld [vmem:[#allocation6 + $0xd4] ss:$8 sps:$4 sm:$0xff]  }
  0x39   :  { %v193_v49 = vld [vmem:[#allocation3 + $0x20] sm:$0xff]  ;;  %v191_v53 = vld [vmem:[#allocation3 + $0x10] sm:$0xff] }
  0x3a   :  { %886 = vmatpush1.bf16.msra.mxu1 %v1462_v18  ;;  %v1506_v50 = vld [vmem:[#allocation6 + $0xc4] ss:$8 sps:$4 sm:$0xff]   ;;  %v1265_v52 = vcombine.high %v189_v48, %v193_v49  ;;  %v195_v54 = vld [vmem:[#allocation3 + $0x30] sm:$0xff]  ;;  %v1510_v56 = vld [vmem:[#allocation6 + $0xc0] ss:$8 sps:$4 sm:$0xff]   ;;  %v1264_v8 = vcombine.low %v189_v48, %v193_v49 }
  0x3b   :  { %972 = vmatpush1.bf16.msra.mxu0 %v1463_v19  ;;  %887 = vmatprep.subr.bf16.mxu1 %v1464_v20  ;;  %v1508_v51 = vld [vmem:[#allocation6 + $0x2c4] ss:$8 sps:$4 sm:$0xff]   ;;  %v1269_v55 = vcombine.high %v191_v53, %v195_v54  ;;  %v1511_v57 = vld [vmem:[#allocation6 + $0x2c0] ss:$8 sps:$4 sm:$0xff]   ;;  %v1514_v59 = vld [vmem:[#allocation6 + $0x2d4] ss:$8 sps:$4 sm:$0xff]   ;;  %v1268_v10 = vcombine.low %v191_v53, %v195_v54 }
  0x3c   :  { %973 = vmatprep.subr.bf16.mxu0 %v1466_v21  ;;  %909 = vmatprep.mubr.bf16.mxu1 %v1265_v52  ;;  %v1516_v60 = vld [vmem:[#allocation6 + $0xd0] ss:$8 sps:$4 sm:$0xff]   ;;  %v1518_v62 = vld [vmem:[#allocation6 + $0xe4] ss:$8 sps:$4 sm:$0xff]   ;;  %v1522_v0 = vld [vmem:[#allocation6 + $0xe0] ss:$8 sps:$4 sm:$0xff]  }
  0x3d   :  { %995 = vmatprep.mubr.bf16.mxu0 %v1269_v55  ;;  %v1517_v61 = vld [vmem:[#allocation6 + $0x2d0] ss:$8 sps:$4 sm:$0xff]   ;;  %v1520_v63 = vld [vmem:[#allocation6 + $0x2e4] ss:$8 sps:$4 sm:$0xff]   ;;  %v1523_v1 = vld [vmem:[#allocation6 + $0x2e0] ss:$8 sps:$4 sm:$0xff]  }
  0x3e   :  { %888 = vmatpush1.bf16.msra.mxu1 %v1468_v22  ;;  %v1524_v2 = vld [vmem:[#allocation6 + $0xf4] ss:$8 sps:$4 sm:$0xff]   ;;  %v1528_v4 = vld [vmem:[#allocation6 + $0xf0] ss:$8 sps:$4 sm:$0xff]   ;;  %v1532_v6 = vld [vmem:[#allocation6 + $0x104] ss:$8 sps:$4 sm:$0xff]  }
  0x3f   :  { %974 = vmatpush1.bf16.msra.mxu0 %v1469_v23  ;;  %889 = vmatprep.subr.bf16.mxu1 %v1470_v24  ;;  %v1526_v3 = vld [vmem:[#allocation6 + $0x2f4] ss:$8 sps:$4 sm:$0xff]   ;;  %v1529_v5 = vld [vmem:[#allocation6 + $0x2f0] ss:$8 sps:$4 sm:$0xff]   ;;  %v1535_v7 = vld [vmem:[#allocation6 + $0x304] ss:$8 sps:$4 sm:$0xff]  }
  0x40   :  { %975 = vmatprep.subr.bf16.mxu0 %v1472_v25  ;;  %v1530_v9 = vld [vmem:[#allocation6 + $0x100] ss:$8 sps:$4 sm:$0xff]   ;;  %v1538_v12 = vld [vmem:[#allocation6 + $0x114] ss:$8 sps:$4 sm:$0xff]   ;;  %v1536_v14 = vld [vmem:[#allocation6 + $0x110] ss:$8 sps:$4 sm:$0xff]  }
  0x41   :  { %v1533_v11 = vld [vmem:[#allocation6 + $0x300] ss:$8 sps:$4 sm:$0xff]   ;;  %v1541_v13 = vld [vmem:[#allocation6 + $0x314] ss:$8 sps:$4 sm:$0xff]   ;;  %v1539_v15 = vld [vmem:[#allocation6 + $0x310] ss:$8 sps:$4 sm:$0xff]  }
  0x42   :  { %890 = vmatpush1.bf16.msra.mxu1 %v1474_v26  ;;  %v1544_v16 = vld [vmem:[#allocation6 + $0x124] ss:$8 sps:$4 sm:$0xff]   ;;  %v1542_v18 = vld [vmem:[#allocation6 + $0x120] ss:$8 sps:$4 sm:$0xff]   ;;  %v1550_v20 = vld [vmem:[#allocation6 + $0x134] ss:$8 sps:$4 sm:$0xff]  }
  0x43   :  { %976 = vmatpush1.bf16.msra.mxu0 %v1475_v27  ;;  %891 = vmatprep.subr.bf16.mxu1 %v1476_v28  ;;  %v1547_v17 = vld [vmem:[#allocation6 + $0x324] ss:$8 sps:$4 sm:$0xff]   ;;  %v1545_v19 = vld [vmem:[#allocation6 + $0x320] ss:$8 sps:$4 sm:$0xff]   ;;  %v1553_v21 = vld [vmem:[#allocation6 + $0x334] ss:$8 sps:$4 sm:$0xff]  }
  0x44   :  { %977 = vmatprep.subr.bf16.mxu0 %v1478_v29  ;;  %v1548_v22 = vld [vmem:[#allocation6 + $0x130] ss:$8 sps:$4 sm:$0xff]   ;;  %v1556_v24 = vld [vmem:[#allocation6 + $0x144] ss:$8 sps:$4 sm:$0xff]   ;;  %v1554_v26 = vld [vmem:[#allocation6 + $0x140] ss:$8 sps:$4 sm:$0xff]  }
  0x45   :  { %v1551_v23 = vld [vmem:[#allocation6 + $0x330] ss:$8 sps:$4 sm:$0xff]   ;;  %v1559_v25 = vld [vmem:[#allocation6 + $0x344] ss:$8 sps:$4 sm:$0xff]   ;;  %v1557_v27 = vld [vmem:[#allocation6 + $0x340] ss:$8 sps:$4 sm:$0xff]  }
  0x46   :  { %892 = vmatpush1.bf16.msra.mxu1 %v1480_v30  ;;  %v1562_v28 = vld [vmem:[#allocation6 + $0x154] ss:$8 sps:$4 sm:$0xff]   ;;  %v1560_v30 = vld [vmem:[#allocation6 + $0x150] ss:$8 sps:$4 sm:$0xff]   ;;  %v1578_v48 = vld [vmem:[#allocation6 + $0x180] ss:$8 sps:$4 sm:$0xff]  }
  0x47   :  { %978 = vmatpush1.bf16.msra.mxu0 %v1481_v31  ;;  %893 = vmatprep.subr.bf16.mxu1 %v1482_v32  ;;  %v1565_v29 = vld [vmem:[#allocation6 + $0x354] ss:$8 sps:$4 sm:$0xff]   ;;  %v1563_v31 = vld [vmem:[#allocation6 + $0x350] ss:$8 sps:$4 sm:$0xff]   ;;  %v1568_v32 = vld [vmem:[#allocation6 + $0x164] ss:$8 sps:$4 sm:$0xff]  }
  0x48   :  { %979 = vmatprep.subr.bf16.mxu0 %v1484_v33  ;;  %v1571_v33 = vld [vmem:[#allocation6 + $0x364] ss:$8 sps:$4 sm:$0xff]   ;;  %v1581_v49 = vld [vmem:[#allocation6 + $0x380] ss:$8 sps:$4 sm:$0xff]   ;;  %v1584_v52 = vld [vmem:[#allocation6 + $0x190] ss:$8 sps:$4 sm:$0xff]  }
  0x49   :  { %v1587_v53 = vld [vmem:[#allocation6 + $0x390] ss:$8 sps:$4 sm:$0xff]   ;;  %v1592_v54 = vld [vmem:[#allocation6 + $0x1a4] ss:$8 sps:$4 sm:$0xff]  }
  0x4a   :  { %894 = vmatpush1.bf16.msra.mxu1 %v1486_v34  ;;  %v1800_v34 = vld [vmem:[#allocation3 + $0x8] sm:$0xff] }
  0x4b   :  { %980 = vmatpush1.bf16.msra.mxu0 %v1487_v35  ;;  %895 = vmatprep.subr.bf16.mxu1 %v1488_v36  ;;  %v1802_v35 = vld [vmem:[#allocation3 + $0x28] sm:$0xff]  ;;  %v1804_v36 = vld [vmem:[#allocation3 + $0x18] sm:$0xff] }
  0x4c   :  { %981 = vmatprep.subr.bf16.mxu0 %v1490_v37  ;;  %v1806_v37 = vld [vmem:[#allocation3 + $0x38] sm:$0xff]  ;;  %v1595_v55 = vld [vmem:[#allocation6 + $0x3a4] ss:$8 sps:$4 sm:$0xff]  }
  0x4e   :  { %896 = vmatpush1.bf16.msra.mxu1 %v1492_v38  ;;  %v1566_v38 = vld [vmem:[#allocation6 + $0x160] ss:$8 sps:$4 sm:$0xff]  }
  0x4f   :  { %982 = vmatpush1.bf16.msra.mxu0 %v1493_v39  ;;  %897 = vmatprep.subr.bf16.mxu1 %v1494_v40  ;;  %v1569_v39 = vld [vmem:[#allocation6 + $0x360] ss:$8 sps:$4 sm:$0xff]   ;;  %v1267_v40 = vcombine.high %v1800_v34, %v1802_v35 }
  0x50   :  { %983 = vmatprep.subr.bf16.mxu0 %v1496_v41  ;;  %v1574_v41 = vld [vmem:[#allocation6 + $0x174] ss:$8 sps:$4 sm:$0xff]  }
  0x52   :  { %898 = vmatpush1.bf16.msra.mxu1 %v1498_v42  ;;  %v1577_v42 = vld [vmem:[#allocation6 + $0x374] ss:$8 sps:$4 sm:$0xff]  }
  0x53   :  { %984 = vmatpush1.bf16.msra.mxu0 %v1499_v43  ;;  %899 = vmatprep.subr.bf16.mxu1 %v1500_v44  ;;  %v1271_v43 = vcombine.high %v1804_v36, %v1806_v37  ;;  %v1572_v44 = vld [vmem:[#allocation6 + $0x170] ss:$8 sps:$4 sm:$0xff]  }
  0x54   :  { %985 = vmatprep.subr.bf16.mxu0 %v1502_v45  ;;  %v1575_v45 = vld [vmem:[#allocation6 + $0x370] ss:$8 sps:$4 sm:$0xff]  }
  0x56   :  { %900 = vmatpush1.bf16.msra.mxu1 %v1504_v46  ;;  %v1580_v46 = vld [vmem:[#allocation6 + $0x184] ss:$8 sps:$4 sm:$0xff]  }
  0x57   :  { %986 = vmatpush1.bf16.msra.mxu0 %v1505_v47  ;;  %901 = vmatprep.subr.bf16.mxu1 %v1506_v50  ;;  %v1583_v47 = vld [vmem:[#allocation6 + $0x384] ss:$8 sps:$4 sm:$0xff]   ;;  %v1586_v50 = vld [vmem:[#allocation6 + $0x194] ss:$8 sps:$4 sm:$0xff]  }
  0x58   :  { %987 = vmatprep.subr.bf16.mxu0 %v1508_v51  ;;  %v1589_v51 = vld [vmem:[#allocation6 + $0x394] ss:$8 sps:$4 sm:$0xff]  }
  0x5a   :  { %902 = vmatpush1.bf16.msra.mxu1 %v1510_v56  ;;  %v1590_v56 = vld [vmem:[#allocation6 + $0x1a0] ss:$8 sps:$4 sm:$0xff]  }
  0x5b   :  { %988 = vmatpush1.bf16.msra.mxu0 %v1511_v57  ;;  %903 = vmatprep.subr.bf16.mxu1 %v1512_v58  ;;  %v1593_v57 = vld [vmem:[#allocation6 + $0x3a0] ss:$8 sps:$4 sm:$0xff]   ;;  %v1598_v58 = vld [vmem:[#allocation6 + $0x1b4] ss:$8 sps:$4 sm:$0xff]  }
  0x5c   :  { %989 = vmatprep.subr.bf16.mxu0 %v1514_v59  ;;  %v1601_v59 = vld [vmem:[#allocation6 + $0x3b4] ss:$8 sps:$4 sm:$0xff]  }
  0x5e   :  { %904 = vmatpush1.bf16.msra.mxu1 %v1516_v60  ;;  %v1596_v60 = vld [vmem:[#allocation6 + $0x1b0] ss:$8 sps:$4 sm:$0xff]  }
  0x5f   :  { %990 = vmatpush1.bf16.msra.mxu0 %v1517_v61  ;;  %905 = vmatprep.subr.bf16.mxu1 %v1518_v62  ;;  %v1599_v61 = vld [vmem:[#allocation6 + $0x3b0] ss:$8 sps:$4 sm:$0xff]   ;;  %v1604_v62 = vld [vmem:[#allocation6 + $0x1c4] ss:$8 sps:$4 sm:$0xff]  }
  0x60   :  { %991 = vmatprep.subr.bf16.mxu0 %v1520_v63  ;;  %v1607_v63 = vld [vmem:[#allocation6 + $0x3c4] ss:$8 sps:$4 sm:$0xff]  }
  0x62   :  { %906 = vmatpush1.bf16.msra.mxu1 %v1522_v0  ;;  %v1602_v0 = vld [vmem:[#allocation6 + $0x1c0] ss:$8 sps:$4 sm:$0xff]  }
  0x63   :  { %992 = vmatpush1.bf16.msra.mxu0 %v1523_v1  ;;  %907 = vmatprep.subr.bf16.mxu1 %v1524_v2  ;;  %v1605_v1 = vld [vmem:[#allocation6 + $0x3c0] ss:$8 sps:$4 sm:$0xff]   ;;  %v1610_v2 = vld [vmem:[#allocation6 + $0x1d4] ss:$8 sps:$4 sm:$0xff]  }
  0x64   :  { %993 = vmatprep.subr.bf16.mxu0 %v1526_v3  ;;  %v1613_v3 = vld [vmem:[#allocation6 + $0x3d4] ss:$8 sps:$4 sm:$0xff]  }
  0x66   :  { %908 = vmatpush1.bf16.msra.mxu1 %v1528_v4  ;;  %v1608_v4 = vld [vmem:[#allocation6 + $0x1d0] ss:$8 sps:$4 sm:$0xff]  }
  0x67   :  { %994 = vmatpush1.bf16.msra.mxu0 %v1529_v5  ;;  %920 = vmatprep.subr.bf16.mxu1 %v1532_v6  ;;  %v1611_v5 = vld [vmem:[#allocation6 + $0x3d0] ss:$8 sps:$4 sm:$0xff]   ;;  %v1616_v6 = vld [vmem:[#allocation6 + $0x1e4] ss:$8 sps:$4 sm:$0xff]  }
  0x68   :  { %1006 = vmatprep.subr.bf16.mxu0 %v1535_v7  ;;  %v1619_v7 = vld [vmem:[#allocation6 + $0x3e4] ss:$8 sps:$4 sm:$0xff]  }
  0x69   :  { %910 = vmatmul.mubr.bf16.vlgmr.msra.gmra.mrb[0].mxu1 %v1264_v8  ;;  %v1614_v8 = vld [vmem:[#allocation6 + $0x1e0] ss:$8 sps:$4 sm:$0xff]  }
  0x6a   :  { %996 = vmatmul.mubr.bf16.vlgmr.msra.gmra.mrb[0].mxu0 %v1268_v10  ;;  %921 = vmatpush1.bf16.msra.mxu1 %v1530_v9  ;;  %v1617_v9 = vld [vmem:[#allocation6 + $0x3e0] ss:$8 sps:$4 sm:$0xff]   ;;  %v1622_v10 = vld [vmem:[#allocation6 + $0x1f4] ss:$8 sps:$4 sm:$0xff]  }
  0x6b   :  { %1007 = vmatpush1.bf16.msra.mxu0 %v1533_v11  ;;  %922 = vmatprep.subr.bf16.mxu1 %v1538_v12  ;;  %v1625_v11 = vld [vmem:[#allocation6 + $0x3f4] ss:$8 sps:$4 sm:$0xff]   ;;  %v1620_v12 = vld [vmem:[#allocation6 + $0x1f0] ss:$8 sps:$4 sm:$0xff]  }
  0x6c   :  { %1008 = vmatprep.subr.bf16.mxu0 %v1541_v13  ;;  %952 = vmatprep.mubr.bf16.mxu1 %v1267_v40  ;;  %v1623_v13 = vld [vmem:[#allocation6 + $0x3f0] ss:$8 sps:$4 sm:$0xff]  }
  0x6d   :  { %1038 = vmatprep.mubr.bf16.mxu0 %v1271_v43 }
  0x6e   :  { %923 = vmatpush1.bf16.msra.mxu1 %v1536_v14  ;;  %v1266_v14 = vcombine.low %v1800_v34, %v1802_v35 }
  0x6f   :  { %1009 = vmatpush1.bf16.msra.mxu0 %v1539_v15  ;;  %924 = vmatprep.subr.bf16.mxu1 %v1544_v16  ;;  %v1270_v15 = vcombine.low %v1804_v36, %v1806_v37  ;;  %v1740_v16 = vmov 0  }
  0x70   :  { %1010 = vmatprep.subr.bf16.mxu0 %v1547_v17  ;;  %1432 = vset.pattern.permute.xlu0 %v1740_v16  ;;  %v1066_v17 = vlaneseq }
  0x71   :  { %1433 = vset.pattern.permute.xlu1 %v1740_v16 }
  0x72   :  { %925 = vmatpush1.bf16.msra.mxu1 %v1542_v18  ;;  %v1816_v18 = vshrl.u32 %v1066_v17, 7  ;;  %v1829_v43 = vand.u32 127, %v1066_v17 }
  0x73   :  { %1011 = vmatpush1.bf16.msra.mxu0 %v1545_v19  ;;  %926 = vmatprep.subr.bf16.mxu1 %v1550_v20  ;;  %v1064_v20 = vld [vmem:[%s1881_s2] sm:$0x3] }
  0x74   :  { %1012 = vmatprep.subr.bf16.mxu0 %v1553_v21  ;;  %v1068_v19 = vsub.s32 0, %v1816_v18  ;;  %v1072_v21 = vsub.s32 1, %v1816_v18 }
  0x76   :  { %927 = vmatpush1.bf16.msra.mxu1 %v1548_v22  ;;  %v1069_v22 = vrot.slane %v1064_v20, %v1068_v19 }
  0x77   :  { %1013 = vmatpush1.bf16.msra.mxu0 %v1551_v23  ;;  %928 = vmatprep.subr.bf16.mxu1 %v1556_v24 }
  0x78   :  { %1014 = vmatprep.subr.bf16.mxu0 %v1559_v25  ;;  %v1073_v25 = vrot.slane %v1064_v20, %v1072_v21 }
  0x7a   :  { %929 = vmatpush1.bf16.msra.mxu1 %v1554_v26 }
  0x7b   :  { %1015 = vmatpush1.bf16.msra.mxu0 %v1557_v27  ;;  %930 = vmatprep.subr.bf16.mxu1 %v1562_v28 }
  0x7c   :  { %1016 = vmatprep.subr.bf16.mxu0 %v1565_v29 }
  0x7e   :  { %931 = vmatpush1.bf16.msra.mxu1 %v1560_v30 }
  0x7f   :  { %1017 = vmatpush1.bf16.msra.mxu0 %v1563_v31  ;;  %932 = vmatprep.subr.bf16.mxu1 %v1568_v32 }
  0x80   :  { %1018 = vmatprep.subr.bf16.mxu0 %v1571_v33 }
  0x82   :  { %933 = vmatpush1.bf16.msra.mxu1 %v1566_v38 }
  0x83   :  { %1019 = vmatpush1.bf16.msra.mxu0 %v1569_v39  ;;  %934 = vmatprep.subr.bf16.mxu1 %v1574_v41 }
  0x84   :  { %1020 = vmatprep.subr.bf16.mxu0 %v1577_v42  ;;  %v1826_v42 = vld [vmem:[%s1882_s3] sm:$0xff] }
  0x85   :  { %vm1185_vm12 = vcmp.ge.s32.totalorder %v1826_v42, 0 }
  0x86   :  { %935 = vmatpush1.bf16.msra.mxu1 %v1572_v44  ;;  %v1832_v44 = vadd.s32 128, %v1829_v43 }
  0x87   :  { %1021 = vmatpush1.bf16.msra.mxu0 %v1575_v45  ;;  %936 = vmatprep.subr.bf16.mxu1 %v1580_v46 }
  0x88   :  { %1022 = vmatprep.subr.bf16.mxu0 %v1583_v47 }
  0x8a   :  { %937 = vmatpush1.bf16.msra.mxu1 %v1578_v48 }
  0x8b   :  { %1023 = vmatpush1.bf16.msra.mxu0 %v1581_v49  ;;  %938 = vmatprep.subr.bf16.mxu1 %v1586_v50 }
  0x8c   :  { %1024 = vmatprep.subr.bf16.mxu0 %v1589_v51 }
  0x8e   :  { %939 = vmatpush1.bf16.msra.mxu1 %v1584_v52 }
  0x8f   :  { %1025 = vmatpush1.bf16.msra.mxu0 %v1587_v53  ;;  %940 = vmatprep.subr.bf16.mxu1 %v1592_v54 }
  0x90   :  { %1026 = vmatprep.subr.bf16.mxu0 %v1595_v55 }
  0x92   :  { %941 = vmatpush1.bf16.msra.mxu1 %v1590_v56 }
  0x93   :  { %1027 = vmatpush1.bf16.msra.mxu0 %v1593_v57  ;;  %942 = vmatprep.subr.bf16.mxu1 %v1598_v58 }
  0x94   :  { %1028 = vmatprep.subr.bf16.mxu0 %v1601_v59 }
  0x96   :  { %943 = vmatpush1.bf16.msra.mxu1 %v1596_v60 }
  0x97   :  { %1029 = vmatpush1.bf16.msra.mxu0 %v1599_v61  ;;  %944 = vmatprep.subr.bf16.mxu1 %v1604_v62 }
  0x98   :  { %1030 = vmatprep.subr.bf16.mxu0 %v1607_v63 }
  0x9a   :  { %945 = vmatpush1.bf16.msra.mxu1 %v1602_v0  ;;  %v1841_v0 = vld [vmem:[%s1882_s3 + $0x8] sm:$0xff]  ;;  %s1742_s3 = smov [#allocation8]  }
  0x9b   :  { %1031 = vmatpush1.bf16.msra.mxu0 %v1605_v1  ;;  %946 = vmatprep.subr.bf16.mxu1 %v1610_v2  ;;  %vm1186_vm13 = vcmp.ge.s32.totalorder %v1841_v0, 0  ;;  %s1237_s24 = sshll.u32 %s1742_s3, 4  ;;  %s1238_s24 = int_to_ptr.vmem [resolvable:$true] %s1237_s24 }
  0x9c   :  { %1032 = vmatprep.subr.bf16.mxu0 %v1613_v3  ;;  %s1682_s25 = scalar_lea.vmem %s1238_s24, 512  ;;  %p1687_p3 = scmp.lt.s32.totalorder %s1238_s24, %s1238_s24 }
  0x9d   :  { %p1683_p2 = scmp.ne.s32.totalorder %s1238_s24, %s1682_s25  ;;  %p1688_p4 = scmp.lt.s32.totalorder %s1682_s25, %s1682_s25 }
  0x9e   :  { %947 = vmatpush1.bf16.msra.mxu1 %v1608_v4 }
  0x9f   :  { %1033 = vmatpush1.bf16.msra.mxu0 %v1611_v5  ;;  %948 = vmatprep.subr.bf16.mxu1 %v1616_v6  ;;  %p1689_p5 = por %p1688_p4, %p1687_p3 }
  0xa0   :  { %1034 = vmatprep.subr.bf16.mxu0 %v1619_v7 }
  0xa1   :  { %p1690_p6 = pnand %p1689_p5, %p1683_p2 }
  0xa2   :  { %949 = vmatpush1.bf16.msra.mxu1 %v1614_v8 }
  0xa3   :  { %1035 = vmatpush1.bf16.msra.mxu0 %v1617_v9  ;;  %950 = vmatprep.subr.bf16.mxu1 %v1622_v10 }
  0xa4   :  { %1036 = vmatprep.subr.bf16.mxu0 %v1625_v11 }
  0xa6   :  { %951 = vmatpush1.bf16.msra.mxu1 %v1620_v12 }
  0xa7   :  { %1037 = vmatpush1.bf16.msra.mxu0 %v1623_v13 }
  0xa9   :  { %953 = vmatmul.mubr.bf16.vlgmr.msra.gmra.mrb[0].mxu1 %v1266_v14 }
  0xaa   :  { %1039 = vmatmul.mubr.bf16.vlgmr.msra.gmra.mrb[0].mxu0 %v1270_v15 }
 0x17c   :  { %v954_v23 = vpop.f32.mrb[0].mxu1 }
 0x17d   :  { %v1040_v24 = vpop.f32.mrb[0].mxu0  ;;  %v956_v27 = vpop.f32.mrb[1].mxu1 }
 0x17e   :  { %v1404_v26 = vadd.f32 %v1040_v24, %v954_v23  ;;  %v1042_v28 = vpop.f32.mrb[1].mxu0  ;;  %v958_v30 = vpop.f32.mrb[2].mxu1 }
 0x17f   :  { %v1405_v29 = vadd.f32 %v1042_v28, %v956_v27  ;;  %v1044_v31 = vpop.f32.mrb[2].mxu0  ;;  %v960_v34 = vpop.f32.mrb[3].mxu1 }
 0x180   :  { %v1076_v32 = vadd.f32 %v1404_v26, %v1069_v22  ;;  %v1406_v33 = vadd.f32 %v1044_v31, %v958_v30  ;;  %v1046_v35 = vpop.f32.mrb[3].mxu0 }
 0x181   :  { %v1077_v36 = vadd.f32 %v1405_v29, %v1073_v25  ;;  %v1407_v37 = vadd.f32 %v1046_v35, %v960_v34 }
 0x182   :  { %1080 = vst [vmem:[#allocation8] sm:$0xff] %v1076_v32  ;;  %v1078_v38 = vadd.f32 %v1406_v33, %v1069_v22 }
 0x183   :  { %1081 = vst [vmem:[#allocation8 + $0x8] sm:$0xff] %v1077_v36  ;;  %v1079_v39 = vadd.f32 %v1407_v37, %v1073_v25  ;;  %v1089_v40 = vmax.f32 %v1076_v32, %v1077_v36 }
 0x184   :  { %1082 = vst [vmem:[#allocation8 + $0x10] sm:$0xff] %v1078_v38 }
 0x185   :  { %1083 = vst [vmem:[#allocation8 + $0x18] sm:$0xff] %v1079_v39  ;;  %1090 = vmax.xlane.f32.xlu0 %v1089_v40  ;;  %v1092_v41 = vmax.f32 %v1078_v38, %v1079_v39  ;;  %v1741_v40 = vmov 0.0  }
 0x189   :  { %1093 = vmax.xlane.f32.xlu0 %v1092_v41 }
 0x19f   :  { %1118 = vperm.xlu0 %1432, %v1826_v42  }
 0x212   :  { %v1091_v45 = vpop.xlane.xlu0 %1090 }
 0x213   :  { %vm1139_vm0 = vcmp.eq.f32.partialorder %v1076_v32, %v1091_v45  ;;  %vm1140_vm1 = vcmp.eq.f32.partialorder %v1077_v36, %v1091_v45  ;;  %v1095_v1 = vsub.f32 %v1076_v32, %v1091_v45  ;;  %v1096_v2 = vsub.f32 %v1077_v36, %v1091_v45 }
 0x214   :  { %v1143_v46 = vsel %vm1139_vm0, %v1829_v43, 256  ;;  %v1144_v47 = vsel %vm1140_vm1, %v1832_v44, 256  ;;  %vm1193_vm0 = vcmask 7168  }
 0x215   :  { %vm1147_vm2 = vcmp.lt.s32.totalorder %v1143_v46, %v1144_v47  ;;  %v1099_v3 = vmul.f32 1.442695, %v1095_v1  ;;  %v1101_v4 = vmul.f32 1.442695, %v1096_v2 }
 0x216   :  { %v1094_v48 = vpop.xlane.xlu0 %1093  ;;  %v1148_v49 = vsel %vm1147_vm2, %v1143_v46, %v1144_v47  ;;  %v1402_v46 = vsel %vm1185_vm12, 1.0, %v1741_v40  ;;  %v1403_v47 = vsel %vm1186_vm13, 1.0, %v1741_v40 }
 0x217   :  { %v1097_v50 = vsub.f32 %v1078_v38, %v1094_v48  ;;  %v1098_v51 = vsub.f32 %v1079_v39, %v1094_v48  ;;  %vm1141_vm3 = vcmp.eq.f32.partialorder %v1078_v38, %v1094_v48  ;;  %vm1142_vm4 = vcmp.eq.f32.partialorder %v1079_v39, %v1094_v48 }
 0x218   :  { %v1150_v52 = vshra.s32 %v1148_v49, 16  ;;  %v1145_v53 = vsel %vm1141_vm3, %v1829_v43, 256  ;;  %v1146_v56 = vsel %vm1142_vm4, %v1832_v44, 256  ;;  %v1149_v12 = vand.u32 65535, %v1148_v49 }
 0x219   :  { %v1103_v54 = vmul.f32 1.442695, %v1097_v50  ;;  %v1105_v55 = vmul.f32 1.442695, %v1098_v51  ;;  %vm1163_vm5 = vcmp.lt.s32.totalorder %v1145_v53, %v1146_v56 }
 0x21a   :  { %v1152_v57 = vcvt.s32.f32 %v1150_v52  ;;  %v1164_v58 = vsel %vm1163_vm5, %v1145_v53, %v1146_v56  ;;  %v1151_v14 = vcvt.s32.f32 %v1149_v12 }
 0x21b   :  { %1626 = vpow2.f32 %v1103_v54  ;;  %v1166_v59 = vshra.s32 %v1164_v58, 16  ;;  %v1165_v15 = vand.u32 65535, %v1164_v58 }
 0x21c   :  { %1628 = vpow2.f32 %v1105_v55  ;;  %1153 = vmin.xlane.f32.xlu1 %v1152_v57 }
 0x21d   :  { %v1168_v60 = vcvt.s32.f32 %v1166_v59  ;;  %1630 = vpow2.f32 %v1099_v3  ;;  %v1167_v19 = vcvt.s32.f32 %v1165_v15 }
 0x21e   :  { %1632 = vpow2.f32 %v1101_v4  ;;  %v1119_v5 = vpop.permute.xlu0 %1118 }
 0x21f   :  { %vm1123_vm6 = vcmp.eq.s32.totalorder %v1829_v43, %v1119_v5  ;;  %vm1124_vm7 = vcmp.eq.s32.totalorder %v1832_v44, %v1119_v5 }
 0x220   :  { %1169 = vmin.xlane.f32.xlu1 %v1168_v60  ;;  %v1127_v9 = vsel %vm1123_vm6, %v1095_v1, 0.0  ;;  %v1128_v10 = vsel %vm1124_vm7, %v1096_v2, 0.0 }
 0x221   :  { %v1131_v11 = vadd.f32 %v1128_v10, %v1127_v9 }
 0x225   :  { %v1627_v61 = vpop.eup %1626 }
 0x226   :  { %v1629_v62 = vpop.eup %1628 }
 0x227   :  { %v1110_v63 = vadd.f32 %v1629_v62, %v1627_v61  ;;  %v1631_v6 = vpop.eup %1630 }
 0x228   :  { %v1633_v7 = vpop.eup %1632 }
 0x229   :  { %1111 = vadd.xlane.f32.xlu0 %v1110_v63  ;;  %v1107_v8 = vadd.f32 %v1633_v7, %v1631_v6 }
 0x231   :  { %1121 = vperm.xlu1 %1433, %v1841_v0  }
 0x255   :  { %1108 = vadd.xlane.f32.xlu1 %v1107_v8 }
 0x259   :  { %1132 = vadd.xlane.f32.xlu1 %v1131_v11 }
 0x2a9   :  { %v1154_v13 = vpop.xlane.xlu1 %1153 }
 0x2aa   :  { %vm1155_vm8 = vcmp.eq.f32.partialorder %v1152_v57, %v1154_v13  ;;  %v1160_v28 = vcvt.f32.s32 %v1154_v13 }
 0x2ab   :  { %v1156_v16 = vsel %vm1155_vm8, %v1151_v14, inf }
 0x2ac   :  { %1157 = vmin.xlane.f32.xlu1 %v1156_v16  ;;  %v1161_v31 = vshll.u32 %v1160_v28, 16 }
 0x2ad   :  { %v1170_v17 = vpop.xlane.xlu1 %1169 }
 0x2ae   :  { %vm1171_vm9 = vcmp.eq.f32.partialorder %v1168_v60, %v1170_v17  ;;  %v1176_v32 = vcvt.f32.s32 %v1170_v17 }
 0x2af   :  { %v1172_v20 = vsel %vm1171_vm9, %v1167_v19, inf }
 0x2b0   :  { %1173 = vmin.xlane.f32.xlu1 %v1172_v20  ;;  %v1177_v37 = vshll.u32 %v1176_v32, 16 }
 0x2b1   :  { %v1122_v21 = vpop.permute.xlu1 %1121 }
 0x2b2   :  { %vm1125_vm10 = vcmp.eq.s32.totalorder %v1829_v43, %v1122_v21  ;;  %vm1126_vm11 = vcmp.eq.s32.totalorder %v1832_v44, %v1122_v21 }
 0x2b3   :  { %v1129_v22 = vsel %vm1125_vm10, %v1097_v50, 0.0  ;;  %v1130_v23 = vsel %vm1126_vm11, %v1098_v51, 0.0 }
 0x2b4   :  { %v1134_v24 = vadd.f32 %v1130_v23, %v1129_v22 }
 0x2b6   :  { %1135 = vadd.xlane.f32.xlu1 %v1134_v24  ;;  %v1112_v26 = vpop.xlane.xlu0 %1111 }
 0x2e2   :  { %v1109_v25 = vpop.xlane.xlu1 %1108 }
 0x2e3   :  { %1634 = vlog2.f32 %v1109_v25 }
 0x2e4   :  { %1636 = vlog2.f32 %v1112_v26 }
 0x2e6   :  { %v1133_v27 = vpop.xlane.xlu1 %1132 }
 0x2ed   :  { %v1635_v29 = vpop.eup %1634 }
 0x2ee   :  { %v1114_v34 = vmul.f32 0.6931472, %v1635_v29  ;;  %v1637_v39 = vpop.eup %1636 }
 0x2ef   :  { %v1116_v48 = vmul.f32 0.6931472, %v1637_v39 }
 0x2f0   :  { %v1137_v44 = vsub.f32 %v1114_v34, %v1133_v27 }
 0x2f2   :  { %v1191_v52 = vmul.f32 %v1402_v46, %v1137_v44 }
 0x2f4   :  { %v1194_v58 = vsel %vm1193_vm0, %v1191_v52, 0.0 }
 0x339   :  { %v1158_v30 = vpop.xlane.xlu1 %1157 }
 0x33a   :  { %v1159_v33 = vcvt.f32.s32 %v1158_v30 }
 0x33c   :  { %v1162_v35 = vadd.s32 %v1161_v31, %v1159_v33 }
 0x33d   :  { %v1174_v36 = vpop.xlane.xlu1 %1173 }
 0x33e   :  { %vm1179_vm14 = vcmp.eq.s32.totalorder %v1162_v35, %v1826_v42  ;;  %v1175_v38 = vcvt.f32.s32 %v1174_v36 }
 0x33f   :  { %v1400_v41 = vsel %vm1179_vm14, 1.0, %v1741_v40 }
 0x340   :  { %v1178_v45 = vadd.s32 %v1177_v37, %v1175_v38  ;;  %v1206_v49 = vmul.f32 %v1402_v46, %v1400_v41 }
 0x342   :  { %vm1180_vm15 = vcmp.eq.s32.totalorder %v1178_v45, %v1841_v0  ;;  %v1208_v42 = vsel %vm1193_vm0, %v1206_v49, 0.0 }
 0x343   :  { %v1136_v50 = vpop.xlane.xlu1 %1135  ;;  %v1401_v51 = vsel %vm1180_vm15, 1.0, %v1741_v40 }
 0x344   :  { %v1138_v53 = vsub.f32 %v1116_v48, %v1136_v50  ;;  %v1207_v54 = vmul.f32 %v1403_v47, %v1401_v51 }
 0x346   :  { %v1192_v55 = vmul.f32 %v1403_v47, %v1138_v53  ;;  %v1209_v56 = vsel %vm1193_vm0, %v1207_v54, 0.0 }
 0x347   :  { %v1210_v57 = vadd.f32 %v1209_v56, %v1208_v42 }
 0x348   :  { %v1195_v59 = vsel %vm1193_vm0, %v1192_v55, 0.0 }
 0x349   :  { %v1196_v60 = vadd.f32 %v1195_v59, %v1194_v58 }
 0x34b   :  { %1197 = vadd.xlane.f32.xlu1 %v1196_v60 }
 0x34f   :  { %1211 = vadd.xlane.f32.xlu1 %v1210_v57 }
 0x350   :  { %1693 = shalt.err (!%p1690_p6)
}
 0x351   :  { %s1694_s28 = scalar_lea.hbm %s1883_s4, 512 }
 0x352   :  { %p1695_p7 = scmp.ne.s32.totalorder %s1883_s4, %s1694_s28  ;;  %p1698_p8 = scmp.lt.u32.totalorder %s1694_s28, %s1883_s4 }
 0x354   :  { %p1700_p9 = pnand %p1698_p8, %p1695_p7 }
 0x356   :  { %1703 = shalt.err (!%p1700_p9)
}
 0x357   :  { %s1743_s8 = smov 256   ;;  %s1744_s9 = smov 16   ;;  %vm1223_vm1 = vcmp.eq.s32.totalorder %v1829_v43, 0  ;;  %vm1225_vm2 = vcmp.eq.s32.totalorder %v1816_v18, 1  ;;  %vm1222_vm3 = vcmp.eq.s32.totalorder %v1816_v18, 0 }
 0x358   :  { %1243 = dma.vmem_to_hbm [thread:$0]  %s1238_s24, 512, %s1883_s4, [#allocation5], %s1743_s8, %s1743_s8, %s1744_s9   ;;  %vm1226_vm4 = vmand %vm1225_vm2, %vm1223_vm1 }
 0x359   :  { %s1745_s12 = smov [#allocation9]   ;;  %vm1224_vm5 = vmand %vm1222_vm3, %vm1223_vm1 }
 0x35a   :  { %s1250_s13 = sshll.u32 %s1745_s12, 4  ;;  %s1251_s13 = int_to_ptr.vmem [resolvable:$true] %s1250_s13 }
 0x35b   :  { %s1704_s15 = scalar_lea.vmem %s1251_s13, 128  ;;  %p1709_p11 = scmp.lt.s32.totalorder %s1251_s13, %s1251_s13 }
 0x35c   :  { %p1705_p10 = scmp.ne.s32.totalorder %s1251_s13, %s1704_s15  ;;  %p1710_p12 = scmp.lt.s32.totalorder %s1704_s15, %s1704_s15 }
 0x35e   :  { %p1711_p13 = por %p1710_p12, %p1709_p11 }
 0x360   :  { %p1712_p0 = pnand %p1711_p13, %p1705_p10 }
 0x3d8   :  { %v1198_v61 = vpop.xlane.xlu1 %1197 }
 0x3d9   :  { %v1199_v62 = vrot.slane %v1198_v61, 4 }
 0x3db   :  { %v1200_v63 = vadd.f32 %v1199_v62, %v1198_v61 }
 0x3dc   :  { %v1212_v0 = vpop.xlane.xlu1 %1211 }
 0x3dd   :  { %v1201_v1 = vrot.slane %v1200_v63, 2  ;;  %v1213_v2 = vrot.slane %v1212_v0, 4 }
 0x3df   :  { %v1214_v3 = vadd.f32 %v1213_v2, %v1212_v0  ;;  %v1202_v4 = vadd.f32 %v1201_v1, %v1200_v63 }
 0x3e1   :  { %v1215_v5 = vrot.slane %v1214_v3, 2  ;;  %v1203_v6 = vrot.slane %v1202_v4, 1 }
 0x3e3   :  { %v1216_v7 = vadd.f32 %v1215_v5, %v1214_v3  ;;  %v1204_v8 = vadd.f32 %v1203_v6, %v1202_v4 }
 0x3e5   :  { %1416 = vpush %v1204_v8  ;;  %v1217_v9 = vrot.slane %v1216_v7, 1 }
 0x3e7   :  { %v1218_v10 = vadd.f32 %v1217_v9, %v1216_v7 }
 0x3e9   :  { %1418 = vpush %v1218_v10 }
 0x416   :  { %s1417_s4 = spop %1416 }
 0x417   :  { %v1229_v12 = vstv %s1417_s4 }
 0x41a   :  { %s1419_s14 = spop %1418 }
 0x41b   :  { %v1227_v11 = vstv %s1419_s14 }
 0x41c   :  { %v1228_v13 = vsel %vm1226_vm4, %v1227_v11, 0.0 }
 0x41d   :  { %v1230_v14 = vsel %vm1224_vm5, %v1229_v12, %v1228_v13 }
 0x41e   :  { %1231 = vst [vmem:[#allocation9] sm:$0xff] %v1230_v14 }
 0x41f   :  { %1715 = shalt.err (!%p1712_p0)
}
 0x420   :  { %s1716_s17 = scalar_lea.hbm %s1884_s5, 128 }
 0x421   :  { %p1717_p1 = scmp.ne.s32.totalorder %s1884_s5, %s1716_s17  ;;  %p1720_p2 = scmp.lt.u32.totalorder %s1716_s17, %s1884_s5 }
 0x423   :  { %p1722_p3 = pnand %p1720_p2, %p1717_p1 }
 0x425   :  { %1725 = shalt.err (!%p1722_p3)
}
 0x426   :  { %1253 = dma.vmem_to_hbm [thread:$0]  %s1251_s13, 128, %s1884_s5, [#allocation10]  }
 0x427   :  { %1730 = dma.done.wait [#allocation5], 512  }
 0x428   :  { %1731 = vsyncadd [#allocation5], 4294966784 }
 0x429   :  { %1732 = dma.done.wait [#allocation10], 128  }
 0x42a   :  { %1733 = vsyncadd [#allocation10], 4294967168 }
 0x42b   :  { %1260 = vsyncpa [#allocation4], 1 }
 0x42c   :  { %1261 = vsyncpa [#allocation7], 1 }
 0x42d   :  { %1262 = vsyncpa [#allocation5], 1 }
 0x42e   :  { %1263 = vsyncpa [#allocation10], 1 }

</bundles_post_ra>
